<compile_context>
chip_gen: v7x
topology: tpu7x:2x2x1
jax: 0.10.0
libtpu: 0.0.40
codegen_flags: <defaults>
</compile_context>

<pallas_src>
import jax
import jax.numpy as jnp
from jax.experimental import pallas as pl
from jax.experimental.pallas import tpu as pltpu


def add_pos_kernel(x_ref, pos_ref, o_ref):
    # x_ref: (TB, S*E) tile of rows; pos_ref: (1, S*E), broadcast over the rows.
    o_ref[...] = x_ref[...] + pos_ref[...]


def learnable_positional_embedding(x, pos_embedding, *, target_tile_bytes=2 * 1024 * 1024):
    """x: (B, S, E), pos_embedding: (1, S, E) -> (B, S, E)  (S = num_patches + 1)."""
    B, S, E = x.shape
    assert pos_embedding.shape == (1, S, E)

    row = S * E
    itemsize = jnp.dtype(x.dtype).itemsize
    row_bytes = row * itemsize

    # Rows per grid step: target ~target_tile_bytes of x per tile.
    tb = min(B, max(1, target_tile_bytes // row_bytes))
    if tb < B:
        # Keep the second-to-last block dim sublane-aligned (multiple of 8)
        # whenever it is not the full array extent.
        tb = max(8, (tb // 8) * 8)
    b_pad = ((B + tb - 1) // tb) * tb  # pad so the grid tiles B exactly

    # Lane-dense 2-D views: trailing dim is S*E (full-extent block on last axis).
    x2 = x.reshape(B, row)
    pos2 = pos_embedding.reshape(1, row)
    if b_pad != B:
        x2 = jnp.pad(x2, ((0, b_pad - B), (0, 0)))

    grid = (b_pad // tb,)

    out2 = pl.pallas_call(
        add_pos_kernel,
        out_shape=jax.ShapeDtypeStruct((b_pad, row), x.dtype),
        grid=grid,
        in_specs=[
            # TB rows of x per grid step.
            pl.BlockSpec((tb, row), lambda b: (b, 0)),
            # Positional embedding: same block every step -> DMA'd once.
            pl.BlockSpec((1, row), lambda b: (0, 0)),
        ],
        out_specs=pl.BlockSpec((tb, row), lambda b: (b, 0)),
        compiler_params=pltpu.CompilerParams(
            dimension_semantics=("parallel",),
        ),
    )(x2, pos2)

    if b_pad != B:
        out2 = out2[:B]
    return out2.reshape(B, S, E)


if __name__ == "__main__":
    # Module config (synthetic, deterministic): num_patches=8, embed_dim=32.
    num_patches = 8
    embed_dim = 32
    batch = 2
    seq = num_patches + 1  # +1 for the class token, as in the PyTorch module

    key = jax.random.PRNGKey(0)
    k_x, k_pos = jax.random.split(key)

    # x: (B, num_patches+1, embed_dim)
    x = jax.random.normal(k_x, (batch, seq, embed_dim), dtype=jnp.float32)
    # pos_embedding ~ torch.randn(1, num_patches+1, embed_dim)
    pos_embedding = jax.random.normal(k_pos, (1, seq, embed_dim), dtype=jnp.float32)

    out = learnable_positional_embedding(x, pos_embedding)
    out = jax.block_until_ready(out)

    # Sanity check against plain-JAX broadcast add.
    ref = x + pos_embedding
    assert out.shape == (batch, seq, embed_dim)
    assert jnp.allclose(out, ref, atol=1e-6, rtol=1e-6)

    print("KERNEL_OK")
</pallas_src>

<mosaic_0001>
module attributes {stable_mosaic.version = 11 : i64} {
  func.func @add_pos_kernel(%arg0: i32, %arg1: memref<2x288xf32, #tpu.memory_space<vmem>>, %arg2: memref<1x288xf32, #tpu.memory_space<vmem>>, %arg3: memref<2x288xf32, #tpu.memory_space<vmem>>) attributes {dimension_semantics = [#tpu.dimension_semantics<parallel>], iteration_bounds = array<i64: 1>, scalar_prefetch = 0 : i64, scratch_operands = 0 : i64, tpu.core_type = #tpu.core_type<tc>, window_params = [{transform_indices = @transform_0, window_bounds = array<i64: 2, 288>}, {pipeline_mode = #tpu.pipeline_mode<synchronous>, transform_indices = @transform_1, window_bounds = array<i64: 1, 288>}, {transform_indices = @transform_2, window_bounds = array<i64: 2, 288>}]} {
    %c0 = arith.constant 0 : index
    %c0_0 = arith.constant 0 : index
    %0 = vector.load %arg1[%c0, %c0_0] : memref<2x288xf32, #tpu.memory_space<vmem>>, vector<2x288xf32>
    %c0_1 = arith.constant 0 : index
    %c0_2 = arith.constant 0 : index
    %1 = vector.load %arg2[%c0_1, %c0_2] : memref<1x288xf32, #tpu.memory_space<vmem>>, vector<1x288xf32>
    %2 = vector.broadcast %1 : vector<1x288xf32> to vector<2x288xf32>
    %3 = arith.addf %0, %2 : vector<2x288xf32>
    %c0_3 = arith.constant 0 : index
    %c0_4 = arith.constant 0 : index
    %4 = vector.load %arg3[%c0_3, %c0_4] : memref<2x288xf32, #tpu.memory_space<vmem>>, vector<2x288xf32>
    tpu.vector_store %arg3[%c0_3, %c0_4], %3 {strides = array<i32>} : memref<2x288xf32, #tpu.memory_space<vmem>>, vector<2x288xf32>,
    return
  }
  func.func @transform_0(%arg0: i32) -> (i32, i32) {
    %c0_i32 = arith.constant 0 : i32
    %c0_i32_0 = arith.constant 0 : i32
    return %arg0, %c0_i32 : i32, i32
  }
  func.func @transform_1(%arg0: i32) -> (i32, i32) {
    %c0_i32 = arith.constant 0 : i32
    %c0_i32_0 = arith.constant 0 : i32
    %c0_i32_1 = arith.constant 0 : i32
    return %c0_i32, %c0_i32_0 : i32, i32
  }
  func.func @transform_2(%arg0: i32) -> (i32, i32) {
    %c0_i32 = arith.constant 0 : i32
    %c0_i32_0 = arith.constant 0 : i32
    return %arg0, %c0_i32 : i32, i32
  }
}

</mosaic_0001>

<bundles_post_ra>
// kernel: tpu_custom_call.1
= control target key start
LH: loop header
LB: loop body
LE: loop exit
PB: predicated region body
PF: predicated region fallthrough
CT: control target
= control target key end

     0   :  { %7 = vsyncpa [#allocation3], 0  ;;  %s174_s0 = inlined_call_operand.hbm [shape: f32[2,288], index: 0, kind: input, shape index: {}]   ;;  %s175_s1 = inlined_call_operand.vmem [shape: f32[1,288], index: 1, kind: input, shape index: {}]   ;;  %s176_s2 = inlined_call_operand.hbm [shape: f32[2,288], index: 2, kind: output, shape index: {}]  }
   0x1   :  { %8 = vsyncpa [#allocation4], 0  ;;  %s129_s9 = smov [#allocation2]   ;;  %s81_s13 = scalar_lea.hbm %s174_s0, 96 }
   0x2   :  { %s15_s10 = sshll.u32 %s129_s9, 4  ;;  %p82_p0 = scmp.ne.s32.totalorder %s174_s0, %s81_s13  ;;  %s16_s10 = int_to_ptr.vmem [resolvable:$true] %s15_s10 }
   0x3   :  { %p85_p1 = scmp.lt.u32.totalorder %s81_s13, %s174_s0 }
   0x5   :  { %p87_p2 = pnand %p85_p1, %p82_p0 }
   0x7   :  { %90 = shalt.err (!%p87_p2)
}
   0x8   :  { %s91_s18 = scalar_lea.vmem %s16_s10, 96  ;;  %p96_p4 = scmp.lt.s32.totalorder %s16_s10, %s16_s10 }
   0x9   :  { %p92_p3 = scmp.ne.s32.totalorder %s16_s10, %s91_s18  ;;  %p97_p5 = scmp.lt.s32.totalorder %s91_s18, %s91_s18 }
   0xb   :  { %p98_p6 = por %p97_p5, %p96_p4 }
   0xd   :  { %p99_p7 = pnand %p98_p6, %p92_p3 }
   0xf   :  { %102 = shalt.err (!%p99_p7)
}
  0x10   :  { %18 = dma.hbm_to_vmem [thread:$0]  %s174_s0, 96, %s16_s10, [#allocation3]  }
  0x11   :  { %125 = dma.done.wait [#allocation3], 96  }
  0x12   :  { %126 = vsyncadd [#allocation3], 4294967200  ;;  %v27_v0 = vlaneseq  ;;  %v130_v1 = vmov 1983009808   ;;  %v25_v9 = vld [vmem:[%s175_s1] sm:$0x7] }
  0x13   :  { %v41_v2 = vunpack.c.l.s4 %v130_v1  ;;  %vm57_vm0 = vcmask 1041408   ;;  %vm58_vm1 = vcmask 1043458   ;;  %vm60_vm3 = vcmask 259076   ;;  %v24_v16 = vld [vmem:[#allocation2] sm:$0x3f]  ;;  %s131_s0 = smov [#allocation5]  }
  0x14   :  { %v28_v3 = vshrl.u32 %v27_v0, 7  ;;  %vm59_vm2 = vmor %vm58_vm1, %vm57_vm0  ;;  %s69_s23 = sshll.u32 %s131_s0, 4  ;;  %s70_s23 = int_to_ptr.vmem [resolvable:$true] %s69_s23 }
  0x15   :  { %v42_v4 = vunpack.c.0.s8 %v41_v2  ;;  %vm61_vm4 = vmor %vm60_vm3, %vm59_vm2  ;;  %s103_s24 = scalar_lea.vmem %s70_s23, 96  ;;  %p108_p9 = scmp.lt.s32.totalorder %s70_s23, %s70_s23 }
  0x16   :  { %v29_v5 = vsub.s32 0, %v28_v3  ;;  %v33_v6 = vsub.s32 1, %v28_v3  ;;  %v37_v7 = vsub.s32 2, %v28_v3  ;;  %p104_p8 = scmp.ne.s32.totalorder %s70_s23, %s103_s24  ;;  %p109_p10 = scmp.lt.s32.totalorder %s103_s24, %s103_s24 }
  0x17   :  { %v45_v8 = vsub.s32 %v42_v4, %v28_v3 }
  0x18   :  { %v30_v10 = vrot.slane %v25_v9, %v29_v5  ;;  %v34_v11 = vrot.slane %v25_v9, %v33_v6  ;;  %v38_v12 = vrot.slane %v25_v9, %v37_v7  ;;  %p110_p11 = por %p109_p10, %p108_p9 }
  0x1a   :  { %v39_v13 = vcombine.low %v30_v10, %v34_v11  ;;  %v53_v14 = vrot.slane %v38_v12, %v45_v8  ;;  %p111_p12 = pnand %p110_p11, %p104_p8 }
  0x1c   :  { %v46_v15 = vrot.slane %v39_v13, %v45_v8 }
  0x1e   :  { %v54_v17 = vcombine.low %v46_v15, %v53_v14 }
  0x20   :  { %v56_v18 = vadd.f32 %v54_v17, %v24_v16 }
  0x22   :  { %62 = vst.msk [vmem:[#allocation5] sm:$0x3f] %vm61_vm4, %v56_v18 }
  0x23   :  { %114 = shalt.err (!%p111_p12)
}
  0x24   :  { %s115_s26 = scalar_lea.hbm %s176_s2, 96 }
  0x25   :  { %p116_p13 = scmp.ne.s32.totalorder %s176_s2, %s115_s26  ;;  %p119_p0 = scmp.lt.u32.totalorder %s115_s26, %s176_s2 }
  0x27   :  { %p121_p1 = pnand %p119_p0, %p116_p13 }
  0x29   :  { %124 = shalt.err (!%p121_p1)
}
  0x2a   :  { %72 = dma.vmem_to_hbm [thread:$0]  %s70_s23, 96, %s176_s2, [#allocation4]  }
  0x2b   :  { %127 = dma.done.wait [#allocation4], 96  }
  0x2c   :  { %128 = vsyncadd [#allocation4], 4294967200 }
  0x2d   :  { %76 = vsyncpa [#allocation3], 1 }
  0x2e   :  { %77 = vsyncpa [#allocation4], 1 }

</bundles_post_ra>
